<compile_context>
chip_gen: v7x
topology: tpu7x:2x2x1
jax: 0.10.0
libtpu: 0.0.40
codegen_flags: <defaults>
</compile_context>

<pallas_src>
import functools

import jax
import jax.numpy as jnp
from jax.experimental import pallas as pl
from jax.experimental.pallas import tpu as pltpu

IN_FEATURES = 128
HIDDEN = 1024
LANE = 128
MIN_TILE_N = 16     # bf16 hidden packs (16,128) sublanes -> keep tiles multiples of 16
MAX_TILE_N = 1024   # ~12 MiB peak VMEM incl. double buffers; fits every generation


def _round_up(x, m):
    return ((x + m - 1) // m) * m


def qhead_kernel(x_ref, wfc_ref, bfc_ref, whead_ref, bhead_ref, out_ref, *, mu_dim):
    # x tile: [tile_n, 128] f32 from HBM; cast to bf16 so the MXU runs at full rate.
    x = x_ref[...].astype(jnp.bfloat16)

    # fc: [tile_n,128] @ [128,1024] with f32 accumulation.
    h = jnp.dot(x, wfc_ref[...], preferred_element_type=jnp.float32)
    # bf16 epilogue: bias add + leaky_relu(0.1) in maximum-form (valid since slope<1).
    h = h.astype(jnp.bfloat16) + bfc_ref[...]
    h = jnp.maximum(h, h * jnp.bfloat16(0.1))

    # Fused mu|var head: single [tile_n,1024] @ [1024,total_p] matmul, f32 accumulate.
    o = jnp.dot(h, whead_ref[...], preferred_element_type=jnp.float32)
    o = o + bhead_ref[...]

    # exp() only on the var lanes (columns >= mu_dim). Padding lanes see exp(0)=1
    # and are sliced away in the wrapper.
    col = jax.lax.broadcasted_iota(jnp.int32, o.shape, 1)
    o = jnp.where(col >= mu_dim, jnp.exp(o), o)

    out_ref[...] = o.astype(out_ref.dtype)


def qhead_forward(x, w_fc, b_fc, w_mu, b_mu, w_var, b_var):
    """QHead forward.

    x: [N, ...] flattening to 128 features.
    w_fc: [128, 1024], b_fc: [1, 1024]
    w_mu: [1024, mu_dim], b_mu: [1, mu_dim]
    w_var: [1024, var_dim], b_var: [1, var_dim]
    Returns (mu [N, mu_dim], var [N, var_dim]).
    """
    n = x.shape[0]
    x2d = x.reshape(n, -1)
    assert x2d.shape[1] == IN_FEATURES, "QHead expects 128 flattened features"
    out_dtype = x2d.dtype

    mu_dim = w_mu.shape[1]
    var_dim = w_var.shape[1]
    total = mu_dim + var_dim
    total_p = _round_up(total, LANE)

    # Fuse the two heads into one weight/bias slab padded to a lane-dense width.
    # (In a real inference loop these casts/concats/pads would be hoisted and
    # done once per parameter set; under jit they fold to trivial copies.)
    w_head = jnp.pad(jnp.concatenate([w_mu, w_var], axis=1),
                     ((0, 0), (0, total_p - total))).astype(jnp.bfloat16)
    b_head = jnp.pad(jnp.concatenate([b_mu, b_var], axis=1),
                     ((0, 0), (0, total_p - total))).astype(jnp.float32)
    w_fc_bf = w_fc.astype(jnp.bfloat16)
    b_fc_bf = b_fc.astype(jnp.bfloat16)

    # Batch tiling: no padding of x; final partial tile is masked by Pallas.
    # Aim for >= 2 grid steps at moderate n so the v7x megacore can shard them.
    tile_n = max(MIN_TILE_N,
                 min(MAX_TILE_N, _round_up(pl.cdiv(n, 2), MIN_TILE_N)))
    grid_n = pl.cdiv(n, tile_n)

    out = pl.pallas_call(
        functools.partial(qhead_kernel, mu_dim=mu_dim),
        out_shape=jax.ShapeDtypeStruct((n, total_p), out_dtype),
        grid_spec=pl.GridSpec(
            grid=(grid_n,),
            in_specs=[
                pl.BlockSpec((tile_n, IN_FEATURES), lambda i: (i, 0)),
                pl.BlockSpec((IN_FEATURES, HIDDEN), lambda i: (0, 0)),
                pl.BlockSpec((1, HIDDEN), lambda i: (0, 0)),
                pl.BlockSpec((HIDDEN, total_p), lambda i: (0, 0)),
                pl.BlockSpec((1, total_p), lambda i: (0, 0)),
            ],
            out_specs=pl.BlockSpec((tile_n, total_p), lambda i: (i, 0)),
        ),
        compiler_params=pltpu.CompilerParams(
            dimension_semantics=("parallel",),
            vmem_limit_bytes=32 * 1024 * 1024,
        ),
    )(x2d, w_fc_bf, b_fc_bf, w_head, b_head)

    mu = out[:, :mu_dim]
    var = out[:, mu_dim:mu_dim + var_dim]
    return mu, var


def init_params(key, mu_dim, var_dim):
    # Deterministic synthetic init matching nn.Linear shapes (stored transposed).
    keys = jax.random.split(key, 6)

    def linear(kw, kb, fan_in, fan_out):
        bound = 1.0 / jnp.sqrt(jnp.float32(fan_in))
        w = jax.random.uniform(kw, (fan_in, fan_out), jnp.float32, -bound, bound)
        b = jax.random.uniform(kb, (1, fan_out), jnp.float32, -bound, bound)
        return w, b

    w_fc, b_fc = linear(keys[0], keys[1], IN_FEATURES, HIDDEN)
    w_mu, b_mu = linear(keys[2], keys[3], HIDDEN, mu_dim)
    w_var, b_var = linear(keys[4], keys[5], HIDDEN, var_dim)
    return w_fc, b_fc, w_mu, b_mu, w_var, b_var


if __name__ == "__main__":
    key = jax.random.PRNGKey(0)
    kx, kp = jax.random.split(key)

    mu_dim, var_dim = 10, 10
    # Small input consistent with forward: batch=2, 128 channels, 1x1 spatial.
    x = jax.random.normal(kx, (2, 128, 1, 1), dtype=jnp.float32)
    params = init_params(kp, mu_dim, var_dim)

    mu, var = qhead_forward(x, *params)
    mu, var = jax.block_until_ready((mu, var))

    # Reference check in plain JAX (f32); kernel uses bf16 MXU operands with f32
    # accumulation, so compare with a correspondingly relaxed tolerance.
    w_fc, b_fc, w_mu, b_mu, w_var, b_var = params
    x2d = x.reshape(x.shape[0], -1)
    h = x2d @ w_fc + b_fc
    h = jnp.where(h >= 0, h, 0.1 * h)
    mu_ref = h @ w_mu + b_mu
    var_ref = jnp.exp(h @ w_var + b_var)

    assert mu.shape == (2, mu_dim) and var.shape == (2, var_dim)
    assert jnp.allclose(mu, mu_ref, atol=5e-2, rtol=5e-2), "mu mismatch"
    assert jnp.allclose(var, var_ref, atol=5e-2, rtol=5e-2), "var mismatch"

    print("KERNEL_OK")
</pallas_src>

<mosaic_0001>
module attributes {stable_mosaic.version = 11 : i64} {
  func.func @qhead_kernel(%arg0: i32, %arg1: memref<16x128xf32, #tpu.memory_space<vmem>>, %arg2: memref<128x1024xbf16, #tpu.memory_space<vmem>>, %arg3: memref<1x1024xbf16, #tpu.memory_space<vmem>>, %arg4: memref<1024x128xbf16, #tpu.memory_space<vmem>>, %arg5: memref<1x128xf32, #tpu.memory_space<vmem>>, %arg6: memref<16x128xf32, #tpu.memory_space<vmem>>) attributes {dimension_semantics = [#tpu.dimension_semantics<parallel>], iteration_bounds = array<i64: 1>, scalar_prefetch = 0 : i64, scratch_operands = 0 : i64, tpu.core_type = #tpu.core_type<tc>, window_params = [{transform_indices = @transform_0, window_bounds = array<i64: 16, 128>}, {pipeline_mode = #tpu.pipeline_mode<synchronous>, transform_indices = @transform_1, window_bounds = array<i64: 128, 1024>}, {pipeline_mode = #tpu.pipeline_mode<synchronous>, transform_indices = @transform_2, window_bounds = array<i64: 1, 1024>}, {pipeline_mode = #tpu.pipeline_mode<synchronous>, transform_indices = @transform_3, window_bounds = array<i64: 1024, 128>}, {pipeline_mode = #tpu.pipeline_mode<synchronous>, transform_indices = @transform_4, window_bounds = array<i64: 1, 128>}, {transform_indices = @transform_5, window_bounds = array<i64: 16, 128>}]} {
    %c0 = arith.constant 0 : index
    %c0_0 = arith.constant 0 : index
    %0 = vector.load %arg1[%c0, %c0_0] : memref<16x128xf32, #tpu.memory_space<vmem>>, vector<16x128xf32>
    %1 = arith.truncf %0 : vector<16x128xf32> to vector<16x128xbf16>
    %c0_1 = arith.constant 0 : index
    %c0_2 = arith.constant 0 : index
    %2 = vector.load %arg2[%c0_1, %c0_2] : memref<128x1024xbf16, #tpu.memory_space<vmem>>, vector<128x1024xbf16>
    %cst = arith.constant dense<0.000000e+00> : vector<16x1024xf32>
    %3 = tpu.matmul %1, %2, %cst {dimension_numbers = #tpu.dot_dimension_numbers<[1], [0], [0], [1], [0, 0, 1, 1], [], []>} : vector<16x128xbf16>, vector<128x1024xbf16>, vector<16x1024xf32> -> vector<16x1024xf32>
    %4 = arith.truncf %3 : vector<16x1024xf32> to vector<16x1024xbf16>
    %c0_3 = arith.constant 0 : index
    %c0_4 = arith.constant 0 : index
    %5 = vector.load %arg3[%c0_3, %c0_4] : memref<1x1024xbf16, #tpu.memory_space<vmem>>, vector<1x1024xbf16>
    %6 = vector.broadcast %5 : vector<1x1024xbf16> to vector<16x1024xbf16>
    %7 = arith.addf %4, %6 : vector<16x1024xbf16>
    %cst_5 = arith.constant 1.000980e-01 : bf16
    %8 = vector.broadcast %cst_5 : bf16 to vector<16x1024xbf16>
    %9 = arith.mulf %7, %8 : vector<16x1024xbf16>
    %10 = arith.maximumf %7, %9 : vector<16x1024xbf16>
    %c0_6 = arith.constant 0 : index
    %c0_7 = arith.constant 0 : index
    %11 = vector.load %arg4[%c0_6, %c0_7] : memref<1024x128xbf16, #tpu.memory_space<vmem>>, vector<1024x128xbf16>
    %cst_8 = arith.constant dense<0.000000e+00> : vector<16x128xf32>
    %12 = tpu.matmul %10, %11, %cst_8 {dimension_numbers = #tpu.dot_dimension_numbers<[1], [0], [0], [1], [0, 0, 1, 1], [], []>} : vector<16x1024xbf16>, vector<1024x128xbf16>, vector<16x128xf32> -> vector<16x128xf32>
    %c0_9 = arith.constant 0 : index
    %c0_10 = arith.constant 0 : index
    %13 = vector.load %arg5[%c0_9, %c0_10] : memref<1x128xf32, #tpu.memory_space<vmem>>, vector<1x128xf32>
    %14 = vector.broadcast %13 : vector<1x128xf32> to vector<16x128xf32>
    %15 = arith.addf %12, %14 : vector<16x128xf32>
    %16 = tpu.iota {dimensions = array<i32: 1>} : vector<16x128xi32>
    %c10_i32 = arith.constant 10 : i32
    %17 = vector.broadcast %c10_i32 : i32 to vector<16x128xi32>
    %18 = arith.cmpi sge, %16, %17 : vector<16x128xi32>
    %19 = math.exp %15 : vector<16x128xf32>
    %20 = arith.select %18, %19, %15 : vector<16x128xi1>, vector<16x128xf32>
    %c0_11 = arith.constant 0 : index
    %c0_12 = arith.constant 0 : index
    %21 = vector.load %arg6[%c0_11, %c0_12] : memref<16x128xf32, #tpu.memory_space<vmem>>, vector<16x128xf32>
    tpu.vector_store %arg6[%c0_11, %c0_12], %20 {strides = array<i32>} : memref<16x128xf32, #tpu.memory_space<vmem>>, vector<16x128xf32>,
    return
  }
  func.func @transform_0(%arg0: i32) -> (i32, i32) {
    %c0_i32 = arith.constant 0 : i32
    %c0_i32_0 = arith.constant 0 : i32
    return %arg0, %c0_i32 : i32, i32
  }
  func.func @transform_1(%arg0: i32) -> (i32, i32) {
    %c0_i32 = arith.constant 0 : i32
    %c0_i32_0 = arith.constant 0 : i32
    %c0_i32_1 = arith.constant 0 : i32
    return %c0_i32, %c0_i32_0 : i32, i32
  }
  func.func @transform_2(%arg0: i32) -> (i32, i32) {
    %c0_i32 = arith.constant 0 : i32
    %c0_i32_0 = arith.constant 0 : i32
    %c0_i32_1 = arith.constant 0 : i32
    return %c0_i32, %c0_i32_0 : i32, i32
  }
  func.func @transform_3(%arg0: i32) -> (i32, i32) {
    %c0_i32 = arith.constant 0 : i32
    %c0_i32_0 = arith.constant 0 : i32
    %c0_i32_1 = arith.constant 0 : i32
    return %c0_i32, %c0_i32_0 : i32, i32
  }
  func.func @transform_4(%arg0: i32) -> (i32, i32) {
    %c0_i32 = arith.constant 0 : i32
    %c0_i32_0 = arith.constant 0 : i32
    %c0_i32_1 = arith.constant 0 : i32
    return %c0_i32, %c0_i32_0 : i32, i32
  }
  func.func @transform_5(%arg0: i32) -> (i32, i32) {
    %c0_i32 = arith.constant 0 : i32
    %c0_i32_0 = arith.constant 0 : i32
    return %arg0, %c0_i32 : i32, i32
  }
}

</mosaic_0001>

<bundles_post_ra>
// kernel: tpu_custom_call.1
= control target key start
LH: loop header
LB: loop body
LE: loop exit
PB: predicated region body
PF: predicated region fallthrough
CT: control target
= control target key end

     0   :  { %10 = vsyncpa [#allocation3], 0  ;;  %s2045_s0 = inlined_call_operand.hbm [shape: f32[2,128], index: 0, kind: input, shape index: {}]   ;;  %s2046_s1 = inlined_call_operand.hbm [shape: bf16[128,1024], index: 1, kind: input, shape index: {}]   ;;  %s2047_s2 = inlined_call_operand.hbm [shape: bf16[1,1024], index: 2, kind: input, shape index: {}]   ;;  %s2048_s3 = inlined_call_operand.hbm [shape: bf16[1024,128], index: 3, kind: input, shape index: {}]   ;;  %s2049_s4 = inlined_call_operand.vmem [shape: f32[1,128], index: 4, kind: input, shape index: {}]   ;;  %s2050_s5 = inlined_call_operand.hbm [shape: f32[2,128], index: 5, kind: output, shape index: {}]  }
   0x1   :  { %11 = vsyncpa [#allocation6], 0 }
   0x2   :  { %12 = vsyncpa [#allocation9], 0 }
   0x3   :  { %13 = vsyncpa [#allocation4], 0 }
   0x4   :  { %18 = vsyncadd [#allocation3], 224  ;;  %s1903_s18 = smov [#allocation5]   ;;  %s1785_s22 = scalar_lea.hbm %s2046_s1, 8192 }
   0x5   :  { %s31_s19 = sshll.u32 %s1903_s18, 4  ;;  %p1786_p0 = scmp.ne.s32.totalorder %s2046_s1, %s1785_s22  ;;  %s32_s19 = int_to_ptr.vmem [resolvable:$true] %s31_s19 }
   0x6   :  { %p1789_p1 = scmp.lt.u32.totalorder %s1785_s22, %s2046_s1 }
   0x8   :  { %p1791_p2 = pnand %p1789_p1, %p1786_p0 }
   0xa   :  { %1794 = shalt.err (!%p1791_p2)
}
   0xb   :  { %s1795_s27 = scalar_lea.vmem %s32_s19, 8192  ;;  %p1800_p4 = scmp.lt.s32.totalorder %s32_s19, %s32_s19 }
   0xc   :  { %p1796_p3 = scmp.ne.s32.totalorder %s32_s19, %s1795_s27  ;;  %p1801_p5 = scmp.lt.s32.totalorder %s1795_s27, %s1795_s27 }
   0xe   :  { %p1802_p6 = por %p1801_p5, %p1800_p4 }
  0x10   :  { %p1803_p7 = pnand %p1802_p6, %p1796_p3 }
  0x12   :  { %1806 = shalt.err (!%p1803_p7)
}
  0x13   :  { %s1904_s28 = smov 512   ;;  %s1905_s29 = smov 32  }
  0x14   :  { %37 = dma.hbm_to_vmem [thread:$0]  %s2046_s1, 8192, %s32_s19, [#allocation6], %s1904_s28, %s1904_s28, %s1905_s29  }
  0x15   :  { %s1906_s7 = smov [#allocation2]   ;;  %s1807_s11 = scalar_lea.hbm %s2045_s0, 32 }
  0x16   :  { %s19_s8 = sshll.u32 %s1906_s7, 4  ;;  %p1808_p8 = scmp.ne.s32.totalorder %s2045_s0, %s1807_s11  ;;  %s20_s8 = int_to_ptr.vmem [resolvable:$true] %s19_s8 }
  0x17   :  { %p1811_p9 = scmp.lt.u32.totalorder %s1807_s11, %s2045_s0 }
  0x19   :  { %p1813_p10 = pnand %p1811_p9, %p1808_p8 }
  0x1b   :  { %1816 = shalt.err (!%p1813_p10)
}
  0x1c   :  { %s1817_s16 = scalar_lea.vmem %s20_s8, 32  ;;  %s1821_s1 = scalar_lea.vmem %s20_s8, 256 }
  0x1d   :  { %p1818_p11 = scmp.ne.s32.totalorder %s20_s8, %s1817_s16  ;;  %p1822_p12 = scmp.lt.s32.totalorder %s20_s8, %s20_s8 }
  0x1e   :  { %p1823_p13 = scmp.lt.s32.totalorder %s1821_s1, %s1817_s16 }
  0x20   :  { %p1824_p0 = por %p1823_p13, %p1822_p12 }
  0x22   :  { %p1825_p1 = pnand %p1824_p0, %p1818_p11 }
  0x24   :  { %1828 = shalt.err (!%p1825_p1)
}
  0x25   :  { %s1907_s17 = smov 2   ;;  %s1908_s20 = smov [#allocation7]  }
  0x26   :  { %25 = dma.hbm_to_vmem [thread:$0]  %s2045_s0, 32, %s20_s8, [#allocation3], %s1905_s29, %s1905_s29, %s1907_s17  }
  0x27   :  { %s44_s21 = sshll.u32 %s1908_s20, 4  ;;  %s1909_s22 = smov [#allocation8]   ;;  %s45_s21 = int_to_ptr.vmem [resolvable:$true] %s44_s21 }
  0x28   :  { %s53_s23 = sshll.u32 %s1909_s22, 4  ;;  %s1829_s26 = scalar_lea.hbm %s2047_s2, 128  ;;  %s54_s23 = int_to_ptr.vmem [resolvable:$true] %s53_s23 }
  0x29   :  { %p1830_p2 = scmp.ne.s32.totalorder %s2047_s2, %s1829_s26  ;;  %p1833_p3 = scmp.lt.u32.totalorder %s1829_s26, %s2047_s2 }
  0x2b   :  { %p1835_p4 = pnand %p1833_p3, %p1830_p2 }
  0x2d   :  { %1838 = shalt.err (!%p1835_p4)
}
  0x2e   :  { %s1839_s0 = scalar_lea.vmem %s45_s21, 128  ;;  %p1844_p6 = scmp.lt.s32.totalorder %s45_s21, %s45_s21 }
  0x2f   :  { %p1840_p5 = scmp.ne.s32.totalorder %s45_s21, %s1839_s0  ;;  %p1845_p7 = scmp.lt.s32.totalorder %s1839_s0, %s1839_s0 }
  0x31   :  { %p1846_p8 = por %p1845_p7, %p1844_p6 }
  0x33   :  { %p1847_p9 = pnand %p1846_p8, %p1840_p5 }
  0x35   :  { %1850 = shalt.err (!%p1847_p9)
}
  0x36   :  { %47 = dma.hbm_to_vmem [thread:$0]  %s2047_s2, 128, %s45_s21, [#allocation6]  }
  0x37   :  { %s1851_s11 = scalar_lea.hbm %s2048_s3, 8192 }
  0x38   :  { %p1852_p10 = scmp.ne.s32.totalorder %s2048_s3, %s1851_s11  ;;  %p1855_p11 = scmp.lt.u32.totalorder %s1851_s11, %s2048_s3 }
  0x3a   :  { %p1857_p12 = pnand %p1855_p11, %p1852_p10 }
  0x3c   :  { %1860 = shalt.err (!%p1857_p12)
}
  0x3d   :  { %s1861_s16 = scalar_lea.vmem %s54_s23, 8192  ;;  %p1866_p0 = scmp.lt.s32.totalorder %s54_s23, %s54_s23 }
  0x3e   :  { %p1862_p13 = scmp.ne.s32.totalorder %s54_s23, %s1861_s16  ;;  %p1867_p1 = scmp.lt.s32.totalorder %s1861_s16, %s1861_s16 }
  0x40   :  { %p1868_p2 = por %p1867_p1, %p1866_p0 }
  0x42   :  { %p1869_p3 = pnand %p1868_p2, %p1862_p13 }
  0x44   :  { %1872 = shalt.err (!%p1869_p3)
}
  0x45   :  { %s1910_s2 = smov 64   ;;  %s1911_s1 = smov 4  }
  0x46   :  { %59 = dma.hbm_to_vmem [thread:$0]  %s2048_s3, 8192, %s54_s23, [#allocation9], %s1910_s2, %s1910_s2, %s1911_s1  }
  0x47   :  { %1895 = dma.done.wait [#allocation3], 256  }
  0x48   :  { %1896 = vsyncadd [#allocation3], 4294967040 }
  0x49   :  { %1897 = dma.done.wait [#allocation6], 8320  }
  0x4a   :  { %1898 = vsyncadd [#allocation6], 4294958976 }
  0x4b   :  { %1899 = dma.done.wait [#allocation9], 8192  }
  0x4c   :  { %1900 = vsyncadd [#allocation9], 4294959104  ;;  %v1912_v0 = vmov 0   ;;  %v79_v1 = vld [vmem:[#allocation5] sm:$0xff]  ;;  %v80_v3 = vld [vmem:[#allocation5 + $0x8] sm:$0xff] }
  0x4d   :  { %495 = vmatprep.mubr.bf16.mxu0 %v1912_v0  ;;  %538 = vmatprep.mubr.bf16.mxu1 %v1912_v0  ;;  %v83_v2 = vld [vmem:[#allocation5 + $0x20] sm:$0xff]  ;;  %v84_v5 = vld [vmem:[#allocation5 + $0x28] sm:$0xff]  ;;  %v81_v60 = vld [vmem:[#allocation5 + $0x10] sm:$0xff] }
  0x4e   :  { %v1488_v4 = vcombine.high %v79_v1, %v83_v2  ;;  %v1487_v6 = vcombine.low %v79_v1, %v83_v2  ;;  %v87_v7 = vld [vmem:[#allocation5 + $0x40] sm:$0xff]  ;;  %v1490_v9 = vcombine.high %v80_v3, %v84_v5  ;;  %v1489_v10 = vcombine.low %v80_v3, %v84_v5  ;;  %v88_v12 = vld [vmem:[#allocation5 + $0x48] sm:$0xff]  ;;  %v85_v63 = vld [vmem:[#allocation5 + $0x30] sm:$0xff] }
  0x4f   :  { %v91_v8 = vld [vmem:[#allocation5 + $0x60] sm:$0xff]  ;;  %v92_v13 = vld [vmem:[#allocation5 + $0x68] sm:$0xff]  ;;  %v76_v2 = vld [vmem:[#allocation2] sm:$0xff] }
  0x50   :  { %v1496_v11 = vcombine.high %v87_v7, %v91_v8  ;;  %v95_v14 = vld [vmem:[#allocation5 + $0x80] sm:$0xff]  ;;  %463 = vmatprep.subr.bf16.mxu0 %v1488_v4  ;;  %v1498_v15 = vcombine.high %v88_v12, %v92_v13  ;;  %v96_v17 = vld [vmem:[#allocation5 + $0x88] sm:$0xff]  ;;  %506 = vmatprep.subr.bf16.mxu1 %v1490_v9  ;;  %v1495_v19 = vcombine.low %v87_v7, %v91_v8  ;;  %v77_v3 = vld [vmem:[#allocation2 + $0x8] sm:$0xff] }
  0x51   :  { %v99_v16 = vld [vmem:[#allocation5 + $0xa0] sm:$0xff]  ;;  %v100_v18 = vld [vmem:[#allocation5 + $0xa8] sm:$0xff]  ;;  %464 = vmatpush1.bf16.msra.mxu0 %v1487_v6  ;;  %507 = vmatpush1.bf16.msra.mxu1 %v1489_v10  ;;  %v1497_v20 = vcombine.low %v88_v12, %v92_v13  ;;  %v82_v4 = vld [vmem:[#allocation5 + $0x18] sm:$0xff]  ;;  %v1492_v9 = vcombine.high %v81_v60, %v85_v63  ;;  %v1999_v13 = vpack.c.bf16 %v77_v3, %v76_v2 }
  0x52   :  { %465 = vmatprep.subr.bf16.mxu0 %v1496_v11  ;;  %v1504_v21 = vcombine.high %v95_v14, %v99_v16  ;;  %508 = vmatprep.subr.bf16.mxu1 %v1498_v15  ;;  %v1506_v22 = vcombine.high %v96_v17, %v100_v18  ;;  %v103_v23 = vld [vmem:[#allocation5 + $0xc0] sm:$0xff]  ;;  %v104_v25 = vld [vmem:[#allocation5 + $0xc8] sm:$0xff]  ;;  %v1503_v27 = vcombine.low %v95_v14, %v99_v16  ;;  %v86_v5 = vld [vmem:[#allocation5 + $0x38] sm:$0xff] }
  0x53   :  { %v107_v24 = vld [vmem:[#allocation5 + $0xe0] sm:$0xff]  ;;  %v108_v26 = vld [vmem:[#allocation5 + $0xe8] sm:$0xff]  ;;  %v1505_v28 = vcombine.low %v96_v17, %v100_v18  ;;  %v89_v7 = vld [vmem:[#allocation5 + $0x50] sm:$0xff]  ;;  %v1494_v11 = vcombine.high %v82_v4, %v86_v5  ;;  %v1491_v15 = vcombine.low %v81_v60, %v85_v63  ;;  %v1493_v17 = vcombine.low %v82_v4, %v86_v5 }
  0x54   :  { %v1512_v29 = vcombine.high %v103_v23, %v107_v24  ;;  %v1514_v30 = vcombine.high %v104_v25, %v108_v26  ;;  %v111_v31 = vld [vmem:[#allocation5 + $0x100] sm:$0xff]  ;;  %v112_v33 = vld [vmem:[#allocation5 + $0x108] sm:$0xff]  ;;  %v1511_v35 = vcombine.low %v103_v23, %v107_v24  ;;  %v1513_v36 = vcombine.low %v104_v25, %v108_v26  ;;  %v93_v10 = vld [vmem:[#allocation5 + $0x70] sm:$0xff] }
  0x55   :  { %466 = vmatpush1.bf16.msra.mxu0 %v1495_v19  ;;  %509 = vmatpush1.bf16.msra.mxu1 %v1497_v20  ;;  %v115_v32 = vld [vmem:[#allocation5 + $0x120] sm:$0xff]  ;;  %v116_v34 = vld [vmem:[#allocation5 + $0x128] sm:$0xff]  ;;  %v90_v12 = vld [vmem:[#allocation5 + $0x58] sm:$0xff]  ;;  %v1500_v18 = vcombine.high %v89_v7, %v93_v10  ;;  %v1499_v23 = vcombine.low %v89_v7, %v93_v10 }
  0x56   :  { %467 = vmatprep.subr.bf16.mxu0 %v1504_v21  ;;  %510 = vmatprep.subr.bf16.mxu1 %v1506_v22  ;;  %v1520_v37 = vcombine.high %v111_v31, %v115_v32  ;;  %v1522_v38 = vcombine.high %v112_v33, %v116_v34  ;;  %v119_v39 = vld [vmem:[#allocation5 + $0x140] sm:$0xff]  ;;  %v120_v41 = vld [vmem:[#allocation5 + $0x148] sm:$0xff]  ;;  %v1519_v43 = vcombine.low %v111_v31, %v115_v32  ;;  %v94_v14 = vld [vmem:[#allocation5 + $0x78] sm:$0xff] }
  0x57   :  { %v123_v40 = vld [vmem:[#allocation5 + $0x160] sm:$0xff]  ;;  %v124_v42 = vld [vmem:[#allocation5 + $0x168] sm:$0xff]  ;;  %v1521_v44 = vcombine.low %v112_v33, %v116_v34  ;;  %v97_v16 = vld [vmem:[#allocation5 + $0x90] sm:$0xff]  ;;  %v1502_v20 = vcombine.high %v90_v12, %v94_v14  ;;  %v1501_v25 = vcombine.low %v90_v12, %v94_v14 }
  0x58   :  { %v1528_v45 = vcombine.high %v119_v39, %v123_v40  ;;  %v1530_v46 = vcombine.high %v120_v41, %v124_v42  ;;  %v127_v47 = vld [vmem:[#allocation5 + $0x180] sm:$0xff]  ;;  %v128_v49 = vld [vmem:[#allocation5 + $0x188] sm:$0xff]  ;;  %v1527_v51 = vcombine.low %v119_v39, %v123_v40  ;;  %v1529_v52 = vcombine.low %v120_v41, %v124_v42  ;;  %v101_v19 = vld [vmem:[#allocation5 + $0xb0] sm:$0xff] }
  0x59   :  { %468 = vmatpush1.bf16.msra.mxu0 %v1503_v27  ;;  %511 = vmatpush1.bf16.msra.mxu1 %v1505_v28  ;;  %v131_v48 = vld [vmem:[#allocation5 + $0x1a0] sm:$0xff]  ;;  %v132_v50 = vld [vmem:[#allocation5 + $0x1a8] sm:$0xff]  ;;  %v98_v21 = vld [vmem:[#allocation5 + $0x98] sm:$0xff]  ;;  %v1508_v26 = vcombine.high %v97_v16, %v101_v19  ;;  %v1507_v31 = vcombine.low %v97_v16, %v101_v19 }
  0x5a   :  { %469 = vmatprep.subr.bf16.mxu0 %v1512_v29  ;;  %512 = vmatprep.subr.bf16.mxu1 %v1514_v30  ;;  %v1536_v53 = vcombine.high %v127_v47, %v131_v48  ;;  %v135_v54 = vld [vmem:[#allocation5 + $0x1c0] sm:$0xff]  ;;  %v1538_v56 = vcombine.high %v128_v49, %v132_v50  ;;  %v136_v57 = vld [vmem:[#allocation5 + $0x1c8] sm:$0xff]  ;;  %v1535_v59 = vcombine.low %v127_v47, %v131_v48  ;;  %v102_v22 = vld [vmem:[#allocation5 + $0xb8] sm:$0xff] }
  0x5b   :  { %v139_v55 = vld [vmem:[#allocation5 + $0x1e0] sm:$0xff]  ;;  %v140_v58 = vld [vmem:[#allocation5 + $0x1e8] sm:$0xff]  ;;  %v1537_v61 = vcombine.low %v128_v49, %v132_v50  ;;  %v105_v24 = vld [vmem:[#allocation5 + $0xd0] sm:$0xff]  ;;  %v1510_v28 = vcombine.high %v98_v21, %v102_v22  ;;  %v1509_v34 = vcombine.low %v98_v21, %v102_v22 }
  0x5c   :  { %v1544_v62 = vcombine.high %v135_v54, %v139_v55  ;;  %v1546_v1 = vcombine.high %v136_v57, %v140_v58  ;;  %v1543_v6 = vcombine.low %v135_v54, %v139_v55  ;;  %v1545_v8 = vcombine.low %v136_v57, %v140_v58  ;;  %v109_v27 = vld [vmem:[#allocation5 + $0xf0] sm:$0xff]  ;;  %v106_v29 = vld [vmem:[#allocation5 + $0xd8] sm:$0xff]  ;;  %v1716_v3 = vld [vmem:[#allocation8 + $0x40] sm:$0xff]  }
  0x5d   :  { %470 = vmatpush1.bf16.msra.mxu0 %v1511_v35  ;;  %513 = vmatpush1.bf16.msra.mxu1 %v1513_v36  ;;  %v110_v30 = vld [vmem:[#allocation5 + $0xf8] sm:$0xff]  ;;  %v113_v32 = vld [vmem:[#allocation5 + $0x110] sm:$0xff]  ;;  %v1516_v35 = vcombine.high %v105_v24, %v109_v27  ;;  %v1515_v39 = vcombine.low %v105_v24, %v109_v27  ;;  %v1717_v5 = vld [vmem:[#allocation8 + $0xc0] sm:$0xff]  }
  0x5e   :  { %471 = vmatprep.subr.bf16.mxu0 %v1520_v37  ;;  %514 = vmatprep.subr.bf16.mxu1 %v1522_v38  ;;  %v117_v33 = vld [vmem:[#allocation5 + $0x130] sm:$0xff]  ;;  %v114_v36 = vld [vmem:[#allocation5 + $0x118] sm:$0xff]  ;;  %v1518_v38 = vcombine.high %v106_v29, %v110_v30  ;;  %v1517_v42 = vcombine.low %v106_v29, %v110_v30  ;;  %v1718_v7 = vld [vmem:[#allocation8] sm:$0xff]  }
  0x5f   :  { %v118_v37 = vld [vmem:[#allocation5 + $0x138] sm:$0xff]  ;;  %v121_v40 = vld [vmem:[#allocation5 + $0x150] sm:$0xff]  ;;  %v1729_v19 = vld [vmem:[#allocation8 + $0xd8] sm:$0xff]  }
  0x60   :  { %v125_v41 = vld [vmem:[#allocation5 + $0x170] sm:$0xff]  ;;  %v1525_v49 = vcombine.low %v114_v36, %v118_v37  ;;  %v142_v60 = vld [vmem:[#allocation5 + $0x1f8] sm:$0xff]  ;;  %v1731_v21 = vld [vmem:[#allocation8 + $0x98] sm:$0xff]  }
  0x61   :  { %472 = vmatpush1.bf16.msra.mxu0 %v1519_v43  ;;  %515 = vmatpush1.bf16.msra.mxu1 %v1521_v44  ;;  %v122_v43 = vld [vmem:[#allocation5 + $0x158] sm:$0xff]  ;;  %v129_v47 = vld [vmem:[#allocation5 + $0x190] sm:$0xff]  ;;  %v1532_v50 = vcombine.high %v121_v40, %v125_v41  ;;  %v1531_v54 = vcombine.low %v121_v40, %v125_v41  ;;  %v1732_v22 = vld [vmem:[#allocation8 + $0x60] sm:$0xff]   ;;  %v649_v41 = vlaneseq }
  0x62   :  { %473 = vmatprep.subr.bf16.mxu0 %v1528_v45  ;;  %516 = vmatprep.subr.bf16.mxu1 %v1530_v46  ;;  %v126_v44 = vld [vmem:[#allocation5 + $0x178] sm:$0xff]  ;;  %v1526_v45 = vcombine.high %v114_v36, %v118_v37  ;;  %v1523_v46 = vcombine.low %v113_v32, %v117_v33  ;;  %v133_v48 = vld [vmem:[#allocation5 + $0x1b0] sm:$0xff]  ;;  %v1735_v24 = vld [vmem:[#allocation8 + $0xa0] sm:$0xff]  }
  0x63   :  { %v137_v55 = vld [vmem:[#allocation5 + $0x1d0] sm:$0xff]  ;;  %v1533_v57 = vcombine.low %v122_v43, %v126_v44  ;;  %v1540_v58 = vcombine.high %v129_v47, %v133_v48  ;;  %v1724_v14 = vld [vmem:[#allocation8 + $0x50] sm:$0xff]   ;;  %v1747_v36 = vld [vmem:[#allocation8 + $0xb8] sm:$0xff]  }
  0x64   :  { %v1721_v10 = vld [vmem:[#allocation8 + $0xc8] sm:$0xff]   ;;  %v1726_v16 = vld [vmem:[#allocation8 + $0x10] sm:$0xff]   ;;  %v1748_v37 = vld [vmem:[#allocation8 + $0x140] sm:$0xff]  }
  0x65   :  { %474 = vmatpush1.bf16.msra.mxu0 %v1527_v51  ;;  %517 = vmatpush1.bf16.msra.mxu1 %v1529_v52  ;;  %v130_v51 = vld [vmem:[#allocation5 + $0x198] sm:$0xff]  ;;  %v1723_v12 = vld [vmem:[#allocation8 + $0x88] sm:$0xff]  }
  0x66   :  { %475 = vmatprep.subr.bf16.mxu0 %v1536_v53  ;;  %518 = vmatprep.subr.bf16.mxu1 %v1538_v56  ;;  %v134_v52 = vld [vmem:[#allocation5 + $0x1b8] sm:$0xff]  ;;  %v1534_v53 = vcombine.high %v122_v43, %v126_v44  ;;  %v141_v56 = vld [vmem:[#allocation5 + $0x1f0] sm:$0xff]  ;;  %v643_v44 = vld [vmem:[#allocation7] sm:$0xff] }
  0x67   :  { %v1541_v63 = vcombine.low %v130_v51, %v134_v52  ;;  %v1547_v4 = vcombine.low %v137_v55, %v141_v56  ;;  %v1738_v27 = vld [vmem:[#allocation8 + $0x28] sm:$0xff]   ;;  %v1740_v29 = vld [vmem:[#allocation8 + $0x70] sm:$0xff]  }
  0x68   :  { %v1741_v30 = vld [vmem:[#allocation8 + $0xf0] sm:$0xff]  }
  0x69   :  { %476 = vmatpush1.bf16.msra.mxu0 %v1535_v59  ;;  %519 = vmatpush1.bf16.msra.mxu1 %v1537_v61  ;;  %v138_v59 = vld [vmem:[#allocation5 + $0x1d8] sm:$0xff]  ;;  %v1542_v61 = vcombine.high %v130_v51, %v134_v52 }
  0x6a   :  { %477 = vmatprep.subr.bf16.mxu0 %v1544_v62  ;;  %520 = vmatprep.subr.bf16.mxu1 %v1546_v1  ;;  %v1539_v62 = vcombine.low %v129_v47, %v133_v48  ;;  %v1548_v1 = vcombine.high %v137_v55, %v141_v56  ;;  %v1550_v2 = vcombine.high %v138_v59, %v142_v60 }
  0x6d   :  { %478 = vmatpush1.bf16.msra.mxu0 %v1543_v6  ;;  %521 = vmatpush1.bf16.msra.mxu1 %v1545_v8  ;;  %v1549_v6 = vcombine.low %v138_v59, %v142_v60  ;;  %v1719_v8 = vld [vmem:[#allocation8 + $0x80] sm:$0xff]  }
  0x6e   :  { %549 = vmatprep.subr.bf16.mxu0 %v1492_v9  ;;  %592 = vmatprep.subr.bf16.mxu1 %v1494_v11  ;;  %v1720_v9 = vld [vmem:[#allocation8 + $0x48] sm:$0xff]  }
  0x6f   :  { %v1722_v11 = vld [vmem:[#allocation8 + $0x8] sm:$0xff]  }
  0x70   :  { %496 = vmatmul.mubr.bf16.vlgmr.msra.gmra.mrb[0].mxu0 %v1999_v13  ;;  %539 = vmatmul.mubr.bf16.vlgmr.msra.gmra.mrb[0].mxu1 %v1999_v13 }
  0x71   :  { %550 = vmatpush1.bf16.msra.mxu0 %v1491_v15  ;;  %593 = vmatpush1.bf16.msra.mxu1 %v1493_v17  ;;  %v1725_v15 = vld [vmem:[#allocation8 + $0xd0] sm:$0xff]  }
  0x72   :  { %551 = vmatprep.subr.bf16.mxu0 %v1500_v18  ;;  %594 = vmatprep.subr.bf16.mxu1 %v1502_v20  ;;  %v1727_v17 = vld [vmem:[#allocation8 + $0x90] sm:$0xff]   ;;  %v1728_v18 = vld [vmem:[#allocation8 + $0x58] sm:$0xff]  }
  0x73   :  { %581 = vmatprep.mubr.bf16.mxu0 %v1912_v0  ;;  %624 = vmatprep.mubr.bf16.mxu1 %v1912_v0  ;;  %v1524_v0 = vcombine.high %v113_v32, %v117_v33  ;;  %v1730_v20 = vld [vmem:[#allocation8 + $0x18] sm:$0xff]   ;;  %v1743_v32 = vld [vmem:[#allocation8 + $0xb0] sm:$0xff]  }
  0x74   :  { %v1744_v33 = vld [vmem:[#allocation8 + $0x78] sm:$0xff]  }
  0x75   :  { %552 = vmatpush1.bf16.msra.mxu0 %v1499_v23  ;;  %595 = vmatpush1.bf16.msra.mxu1 %v1501_v25  ;;  %v1734_v23 = vld [vmem:[#allocation8 + $0x20] sm:$0xff]   ;;  %v1736_v25 = vld [vmem:[#allocation8 + $0x68] sm:$0xff]  }
  0x76   :  { %553 = vmatprep.subr.bf16.mxu0 %v1508_v26  ;;  %596 = vmatprep.subr.bf16.mxu1 %v1510_v28  ;;  %v1737_v26 = vld [vmem:[#allocation8 + $0xe8] sm:$0xff]  }
  0x77   :  { %v1739_v28 = vld [vmem:[#allocation8 + $0xa8] sm:$0xff]  }
  0x79   :  { %554 = vmatpush1.bf16.msra.mxu0 %v1507_v31  ;;  %597 = vmatpush1.bf16.msra.mxu1 %v1509_v34  ;;  %v1742_v31 = vld [vmem:[#allocation8 + $0x30] sm:$0xff]   ;;  %v1745_v34 = vld [vmem:[#allocation8 + $0xf8] sm:$0xff]  }
  0x7a   :  { %555 = vmatprep.subr.bf16.mxu0 %v1516_v35  ;;  %598 = vmatprep.subr.bf16.mxu1 %v1518_v38  ;;  %v1746_v35 = vld [vmem:[#allocation8 + $0x38] sm:$0xff]   ;;  %v1749_v38 = vld [vmem:[#allocation8 + $0x1c0] sm:$0xff]  }
  0x7d   :  { %556 = vmatpush1.bf16.msra.mxu0 %v1515_v39  ;;  %599 = vmatpush1.bf16.msra.mxu1 %v1517_v42  ;;  %v1913_v39 = vmov 1966171168  }
  0x7e   :  { %557 = vmatprep.subr.bf16.mxu0 %v1524_v0  ;;  %600 = vmatprep.subr.bf16.mxu1 %v1526_v45  ;;  %v647_v40 = vunpack.c.l.s4 %v1913_v39  ;;  %v650_v0 = vshrl.u32 %v649_v41, 7  ;;  %v1764_v39 = vld [vmem:[#allocation8 + $0x160] sm:$0xff]  }
  0x80   :  { %v648_v42 = vunpack.c.0.s8 %v647_v40  ;;  %v2013_v52 = vsub.s32 0, %v650_v0 }
  0x81   :  { %558 = vmatpush1.bf16.msra.mxu0 %v1523_v46  ;;  %601 = vmatpush1.bf16.msra.mxu1 %v1525_v49 }
  0x82   :  { %559 = vmatprep.subr.bf16.mxu0 %v1532_v50  ;;  %602 = vmatprep.subr.bf16.mxu1 %v1534_v53  ;;  %v2008_v43 = vsub.s32 %v648_v42, %v650_v0  ;;  %v1765_v42 = vld [vmem:[#allocation8 + $0x1e0] sm:$0xff]  }
  0x83   :  { %v1766_v0 = vld [vmem:[#allocation8 + $0x120] sm:$0xff]  }
  0x84   :  { %v652_v45 = vrot.slane %v643_v44, %v2008_v43 }
  0x85   :  { %560 = vmatpush1.bf16.msra.mxu0 %v1531_v54  ;;  %603 = vmatpush1.bf16.msra.mxu1 %v1533_v57 }
  0x86   :  { %561 = vmatprep.subr.bf16.mxu0 %v1540_v58  ;;  %604 = vmatprep.subr.bf16.mxu1 %v1542_v61  ;;  %v660_v46 = vcombine.high %v652_v45, %v652_v45  ;;  %v668_v47 = vrot.slane %v652_v45, %v2008_v43  ;;  %v1767_v45 = vld [vmem:[#allocation8 + $0x1a0] sm:$0xff]  }
  0x88   :  { %v682_v48 = vrot.slane %v660_v46, %v2008_v43  ;;  %v690_v49 = vcombine.high %v668_v47, %v668_v47  ;;  %v695_v51 = vpack.i.b16 %v668_v47, %v668_v47  ;;  %v1768_v46 = vld [vmem:[#allocation8 + $0x168] sm:$0xff]  }
  0x89   :  { %562 = vmatpush1.bf16.msra.mxu0 %v1539_v62  ;;  %605 = vmatpush1.bf16.msra.mxu1 %v1541_v63 }
  0x8a   :  { %563 = vmatprep.subr.bf16.mxu0 %v1548_v1  ;;  %606 = vmatprep.subr.bf16.mxu1 %v1550_v2  ;;  %v692_v50 = vcombine.high %v682_v48, %v682_v48  ;;  %v709_v53 = vpack.i.b16 %v690_v49, %v690_v49  ;;  %v702_v54 = vpack.i.b16 %v682_v48, %v682_v48  ;;  %v1769_v48 = vld [vmem:[#allocation8 + $0x1e8] sm:$0xff]  }
  0x8b   :  { %v700_v59 = vrot.slane %v695_v51, %v2013_v52  ;;  %v1771_v51 = vld [vmem:[#allocation8 + $0x128] sm:$0xff]  }
  0x8c   :  { %v716_v55 = vpack.i.b16 %v692_v50, %v692_v50  ;;  %v714_v62 = vrot.slane %v709_v53, %v2013_v52  ;;  %v707_v63 = vrot.slane %v702_v54, %v2013_v52 }
  0x8d   :  { %564 = vmatpush1.bf16.msra.mxu0 %v1547_v4  ;;  %607 = vmatpush1.bf16.msra.mxu1 %v1549_v6 }
  0x8e   :  { %1616 = vmatprep.subr.bf16.mxu0 %v1716_v3  ;;  %1638 = vmatprep.subr.bf16.mxu1 %v1717_v5  ;;  %v721_v4 = vrot.slane %v716_v55, %v2013_v52  ;;  %v1773_v55 = vld [vmem:[#allocation8 + $0x170] sm:$0xff]  }
  0x90   :  { %582 = vmatmul.mubr.bf16.vlgmr.msra.gmra.mrb[4].mxu0 %v1999_v13  ;;  %625 = vmatmul.mubr.bf16.vlgmr.msra.gmra.mrb[4].mxu1 %v1999_v13  ;;  %v1733_v13 = vld [vmem:[#allocation8 + $0xe0] sm:$0xff]  }
  0x91   :  { %1617 = vmatpush3.bf16.msra.mxu0 %v1718_v7  ;;  %1639 = vmatpush3.bf16.msra.mxu1 %v1719_v8 }
  0x92   :  { %1618 = vmatprep.subr.bf16.mxu0 %v1720_v9  ;;  %1640 = vmatprep.subr.bf16.mxu1 %v1721_v10 }
  0x95   :  { %1619 = vmatpush3.bf16.msra.mxu0 %v1722_v11  ;;  %1641 = vmatpush3.bf16.msra.mxu1 %v1723_v12 }
  0x96   :  { %1620 = vmatprep.subr.bf16.mxu0 %v1724_v14  ;;  %1642 = vmatprep.subr.bf16.mxu1 %v1725_v15 }
  0x99   :  { %1621 = vmatpush3.bf16.msra.mxu0 %v1726_v16  ;;  %1643 = vmatpush3.bf16.msra.mxu1 %v1727_v17 }
  0x9a   :  { %1622 = vmatprep.subr.bf16.mxu0 %v1728_v18  ;;  %1644 = vmatprep.subr.bf16.mxu1 %v1729_v19  ;;  %v1750_v19 = vld [vmem:[#allocation8 + $0x100] sm:$0xff]  }
  0x9d   :  { %1623 = vmatpush3.bf16.msra.mxu0 %v1730_v20  ;;  %1645 = vmatpush3.bf16.msra.mxu1 %v1731_v21 }
  0x9e   :  { %1624 = vmatprep.subr.bf16.mxu0 %v1732_v22  ;;  %1646 = vmatprep.subr.bf16.mxu1 %v1733_v13  ;;  %v1751_v22 = vld [vmem:[#allocation8 + $0x180] sm:$0xff]   ;;  %v1752_v13 = vld [vmem:[#allocation8 + $0x148] sm:$0xff]  }
  0xa1   :  { %1625 = vmatpush3.bf16.msra.mxu0 %v1734_v23  ;;  %1647 = vmatpush3.bf16.msra.mxu1 %v1735_v24  ;;  %v645_v23 = vcombine.high %v643_v44, %v643_v44 }
  0xa2   :  { %1626 = vmatprep.subr.bf16.mxu0 %v1736_v25  ;;  %1648 = vmatprep.subr.bf16.mxu1 %v1737_v26  ;;  %v1753_v25 = vld [vmem:[#allocation8 + $0x1c8] sm:$0xff]  }
  0xa3   :  { %v1754_v26 = vld [vmem:[#allocation8 + $0x108] sm:$0xff]  }
  0xa5   :  { %1627 = vmatpush3.bf16.msra.mxu0 %v1738_v27  ;;  %1649 = vmatpush3.bf16.msra.mxu1 %v1739_v28  ;;  %v1755_v27 = vld [vmem:[#allocation8 + $0x188] sm:$0xff]   ;;  %v1756_v28 = vld [vmem:[#allocation8 + $0x150] sm:$0xff]  }
  0xa6   :  { %1628 = vmatprep.subr.bf16.mxu0 %v1740_v29  ;;  %1650 = vmatprep.subr.bf16.mxu1 %v1741_v30  ;;  %v659_v29 = vrot.slane %v645_v23, %v2008_v43  ;;  %v1757_v30 = vld [vmem:[#allocation8 + $0x1d0] sm:$0xff]  }
  0xa9   :  { %1629 = vmatpush3.bf16.msra.mxu0 %v1742_v31  ;;  %1651 = vmatpush3.bf16.msra.mxu1 %v1743_v32  ;;  %v1758_v31 = vld [vmem:[#allocation8 + $0x110] sm:$0xff]  }
  0xaa   :  { %1630 = vmatprep.subr.bf16.mxu0 %v1744_v33  ;;  %1652 = vmatprep.subr.bf16.mxu1 %v1745_v34  ;;  %v1759_v32 = vld [vmem:[#allocation8 + $0x190] sm:$0xff]   ;;  %v1760_v33 = vld [vmem:[#allocation8 + $0x158] sm:$0xff]   ;;  %v661_v34 = vcombine.high %v659_v29, %v659_v29 }
  0xac   :  { %v689_v40 = vrot.slane %v661_v34, %v2008_v43 }
  0xad   :  { %1631 = vmatpush3.bf16.msra.mxu0 %v1746_v35  ;;  %1653 = vmatpush3.bf16.msra.mxu1 %v1747_v36  ;;  %v1761_v35 = vld [vmem:[#allocation8 + $0x1d8] sm:$0xff]  }
  0xae   :  { %1660 = vmatprep.subr.bf16.mxu0 %v1748_v37  ;;  %1682 = vmatprep.subr.bf16.mxu1 %v1749_v38  ;;  %v1762_v36 = vld [vmem:[#allocation8 + $0x118] sm:$0xff]   ;;  %v675_v37 = vrot.slane %v659_v29, %v2008_v43  ;;  %v693_v47 = vcombine.high %v689_v40, %v689_v40  ;;  %v730_v53 = vpack.i.b16 %v689_v40, %v689_v40  ;;  %v1772_v43 = vld [vmem:[#allocation8 + $0x1a8] sm:$0xff]  }
  0xaf   :  { %v1763_v38 = vld [vmem:[#allocation8 + $0x198] sm:$0xff]   ;;  %v1551_v29 = vld [vmem:[%s2049_s4] ss:$0 sm:$0xff] }
  0xb0   :  { %v691_v44 = vcombine.high %v675_v37, %v675_v37  ;;  %v723_v49 = vpack.i.b16 %v675_v37, %v675_v37  ;;  %v744_v54 = vpack.i.b16 %v693_v47, %v693_v47 }
  0xb2   :  { %v737_v50 = vpack.i.b16 %v691_v44, %v691_v44 }
 0x143   :  { %v497_v56 = vpop.f32.mrb[0].mxu0  ;;  %v540_v57 = vpop.f32.mrb[0].mxu1 }
 0x144   :  { %v499_v58 = vpop.f32.mrb[1].mxu0  ;;  %v542_v60 = vpop.f32.mrb[1].mxu1 }
 0x145   :  { %v501_v61 = vpop.f32.mrb[2].mxu0  ;;  %v544_v2 = vpop.f32.mrb[2].mxu1 }
 0x146   :  { %v635_v1 = vpack.c.bf16 %v501_v61, %v497_v56  ;;  %v503_v3 = vpop.f32.mrb[3].mxu0  ;;  %v637_v5 = vpack.c.bf16 %v544_v2, %v540_v57  ;;  %v546_v7 = vpop.f32.mrb[3].mxu1  ;;  %v1774_v57 = vld [vmem:[#allocation8 + $0x1f0] sm:$0xff]  }
 0x147   :  { %v636_v6 = vpack.c.bf16 %v503_v3, %v499_v58  ;;  %v638_v9 = vpack.c.bf16 %v546_v7, %v542_v60  ;;  %v728_v60 = vrot.slane %v723_v49, %v2013_v52  ;;  %v1775_v2 = vld [vmem:[#allocation8 + $0x130] sm:$0xff]  }
 0x148   :  { %v750_v8 = vadd.bf16 %v700_v59, %v635_v1  ;;  %v752_v10 = vadd.bf16 %v714_v62, %v637_v5  ;;  %v735_v1 = vrot.slane %v730_v53, %v2013_v52  ;;  %v1776_v7 = vld [vmem:[#allocation8 + $0x1b0] sm:$0xff]  }
 0x149   :  { %v751_v11 = vadd.bf16 %v707_v63, %v636_v6  ;;  %v753_v14 = vadd.bf16 %v721_v4, %v638_v9  ;;  %v742_v63 = vrot.slane %v737_v50, %v2013_v52  ;;  %v749_v6 = vrot.slane %v744_v54, %v2013_v52 }
 0x14a   :  { %v758_v12 = vmul.bf16 1036860877, %v750_v8  ;;  %v760_v15 = vmul.bf16 1036860877, %v752_v10 }
 0x14b   :  { %v759_v16 = vmul.bf16 1036860877, %v751_v11  ;;  %v761_v17 = vmul.bf16 1036860877, %v753_v14 }
 0x14c   :  { %v766_v20 = vmax.bf16 %v758_v12, %v750_v8  ;;  %v768_v24 = vmax.bf16 %v760_v15, %v752_v10  ;;  %v1777_v8 = vld [vmem:[#allocation8 + $0x178] sm:$0xff]  }
 0x14d   :  { %v767_v18 = vmax.bf16 %v759_v16, %v751_v11  ;;  %v769_v21 = vmax.bf16 %v761_v17, %v753_v14  ;;  %v1778_v12 = vld [vmem:[#allocation8 + $0x1f8] sm:$0xff]  }
 0x14f   :  { %1325 = vmatprep.mubr.bf16.mxu0 %v767_v18  ;;  %1366 = vmatprep.mubr.bf16.mxu1 %v769_v21  ;;  %v1779_v18 = vld [vmem:[#allocation8 + $0x138] sm:$0xff]  }
 0x150   :  { %1326 = vmatmul.mubr.bf16.vlgmr.msra.gmra.mrb[8].mxu0 %v766_v20  ;;  %1367 = vmatmul.mubr.bf16.vlgmr.msra.gmra.mrb[8].mxu1 %v768_v24  ;;  %v1780_v21 = vld [vmem:[#allocation8 + $0x1b8] sm:$0xff]  }
 0x151   :  { %1661 = vmatpush3.bf16.msra.mxu0 %v1750_v19  ;;  %1683 = vmatpush3.bf16.msra.mxu1 %v1751_v22 }
 0x152   :  { %1662 = vmatprep.subr.bf16.mxu0 %v1752_v13  ;;  %1684 = vmatprep.subr.bf16.mxu1 %v1753_v25 }
 0x155   :  { %1663 = vmatpush3.bf16.msra.mxu0 %v1754_v26  ;;  %1685 = vmatpush3.bf16.msra.mxu1 %v1755_v27 }
 0x156   :  { %1664 = vmatprep.subr.bf16.mxu0 %v1756_v28  ;;  %1686 = vmatprep.subr.bf16.mxu1 %v1757_v30 }
 0x159   :  { %1665 = vmatpush3.bf16.msra.mxu0 %v1758_v31  ;;  %1687 = vmatpush3.bf16.msra.mxu1 %v1759_v32 }
 0x15a   :  { %1666 = vmatprep.subr.bf16.mxu0 %v1760_v33  ;;  %1688 = vmatprep.subr.bf16.mxu1 %v1761_v35 }
 0x15d   :  { %1667 = vmatpush3.bf16.msra.mxu0 %v1762_v36  ;;  %1689 = vmatpush3.bf16.msra.mxu1 %v1763_v38 }
 0x15e   :  { %1668 = vmatprep.subr.bf16.mxu0 %v1764_v39  ;;  %1690 = vmatprep.subr.bf16.mxu1 %v1765_v42 }
 0x161   :  { %1669 = vmatpush3.bf16.msra.mxu0 %v1766_v0  ;;  %1691 = vmatpush3.bf16.msra.mxu1 %v1767_v45 }
 0x162   :  { %1670 = vmatprep.subr.bf16.mxu0 %v1768_v46  ;;  %1692 = vmatprep.subr.bf16.mxu1 %v1769_v48 }
 0x163   :  { %v583_v56 = vpop.f32.mrb[4].mxu0  ;;  %v626_v58 = vpop.f32.mrb[4].mxu1 }
 0x164   :  { %v585_v59 = vpop.f32.mrb[5].mxu0  ;;  %v628_v61 = vpop.f32.mrb[5].mxu1 }
 0x165   :  { %v587_v62 = vpop.f32.mrb[6].mxu0  ;;  %1671 = vmatpush3.bf16.msra.mxu0 %v1771_v51  ;;  %v630_v4 = vpop.f32.mrb[6].mxu1  ;;  %1693 = vmatpush3.bf16.msra.mxu1 %v1772_v43 }
 0x166   :  { %v639_v3 = vpack.c.bf16 %v587_v62, %v583_v56  ;;  %v589_v5 = vpop.f32.mrb[7].mxu0  ;;  %1672 = vmatprep.subr.bf16.mxu0 %v1773_v55  ;;  %v641_v9 = vpack.c.bf16 %v630_v4, %v626_v58  ;;  %v632_v11 = vpop.f32.mrb[7].mxu1  ;;  %1694 = vmatprep.subr.bf16.mxu1 %v1774_v57 }
 0x167   :  { %v640_v10 = vpack.c.bf16 %v589_v5, %v585_v59  ;;  %v642_v15 = vpack.c.bf16 %v632_v11, %v628_v61 }
 0x168   :  { %v754_v14 = vadd.bf16 %v728_v60, %v639_v3  ;;  %v756_v16 = vadd.bf16 %v742_v63, %v641_v9  ;;  %v1458_v63 = vand.u32 127, %v649_v41 }
 0x169   :  { %v755_v17 = vadd.bf16 %v735_v1, %v640_v10  ;;  %1673 = vmatpush3.bf16.msra.mxu0 %v1775_v2  ;;  %v757_v20 = vadd.bf16 %v749_v6, %v642_v15  ;;  %1695 = vmatpush3.bf16.msra.mxu1 %v1776_v7 }
 0x16a   :  { %v762_v19 = vmul.bf16 1036860877, %v754_v14  ;;  %1674 = vmatprep.subr.bf16.mxu0 %v1777_v8  ;;  %v764_v52 = vmul.bf16 1036860877, %v756_v16  ;;  %1696 = vmatprep.subr.bf16.mxu1 %v1778_v12  ;;  %vm1459_vm0 = vcmp.ge.s32.totalorder %v1458_v63, 10 }
 0x16b   :  { %v763_v22 = vmul.bf16 1036860877, %v755_v17  ;;  %v765_v13 = vmul.bf16 1036860877, %v757_v20 }
 0x16c   :  { %v770_v24 = vmax.bf16 %v762_v19, %v754_v14  ;;  %v772_v26 = vmax.bf16 %v764_v52, %v756_v16 }
 0x16d   :  { %1675 = vmatpush3.bf16.msra.mxu0 %v1779_v18  ;;  %v771_v23 = vmax.bf16 %v763_v22, %v755_v17  ;;  %1697 = vmatpush3.bf16.msra.mxu1 %v1780_v21  ;;  %v773_v25 = vmax.bf16 %v765_v13, %v757_v20 }
 0x16f   :  { %1407 = vmatprep.mubr.bf16.mxu0 %v771_v23  ;;  %1448 = vmatprep.mubr.bf16.mxu1 %v773_v25 }
 0x170   :  { %1408 = vmatmul.mubr.bf16.vlgmr.msra.gmra.mrb[12].mxu0 %v770_v24  ;;  %1449 = vmatmul.mubr.bf16.vlgmr.msra.gmra.mrb[12].mxu1 %v772_v26 }
 0x223   :  { %v1632_v27 = vpop.f32.mrb[8].mxu0  ;;  %v1654_v28 = vpop.f32.mrb[8].mxu1 }
 0x224   :  { %v1633_v30 = vpop.f32.mrb[9].mxu0  ;;  %v1655_v32 = vpop.f32.mrb[9].mxu1 }
 0x225   :  { %v1634_v31 = vadd.f32 %v1633_v30, %v1632_v27  ;;  %v1635_v33 = vpop.f32.mrb[10].mxu0  ;;  %v1656_v34 = vadd.f32 %v1655_v32, %v1654_v28  ;;  %v1657_v35 = vpop.f32.mrb[10].mxu1 }
 0x226   :  { %v1636_v36 = vpop.f32.mrb[11].mxu0  ;;  %v1658_v39 = vpop.f32.mrb[11].mxu1 }
 0x227   :  { %v1328_v37 = vadd.f32 %v1634_v31, %v1551_v29  ;;  %v1637_v38 = vadd.f32 %v1636_v36, %v1635_v33  ;;  %v1659_v40 = vadd.f32 %v1658_v39, %v1657_v35 }
 0x229   :  { %v1369_v42 = vadd.f32 %v1656_v34, %v1328_v37  ;;  %v1331_v0 = vadd.f32 %v1637_v38, %v1551_v29 }
 0x22b   :  { %v1372_v44 = vadd.f32 %v1659_v40, %v1331_v0 }
 0x243   :  { %v1676_v45 = vpop.f32.mrb[12].mxu0  ;;  %v1698_v46 = vpop.f32.mrb[12].mxu1 }
 0x244   :  { %v1677_v47 = vpop.f32.mrb[13].mxu0  ;;  %v1699_v49 = vpop.f32.mrb[13].mxu1 }
 0x245   :  { %v1678_v48 = vadd.f32 %v1677_v47, %v1676_v45  ;;  %v1679_v50 = vpop.f32.mrb[14].mxu0  ;;  %v1700_v51 = vadd.f32 %v1699_v49, %v1698_v46  ;;  %v1701_v53 = vpop.f32.mrb[14].mxu1 }
 0x246   :  { %v1680_v43 = vpop.f32.mrb[15].mxu0  ;;  %v1702_v56 = vpop.f32.mrb[15].mxu1 }
 0x247   :  { %v1410_v54 = vadd.f32 %v1678_v48, %v1369_v42  ;;  %v1681_v55 = vadd.f32 %v1680_v43, %v1679_v50  ;;  %v1703_v57 = vadd.f32 %v1702_v56, %v1701_v53 }
 0x249   :  { %v1451_v58 = vadd.f32 %v1700_v51, %v1410_v54  ;;  %v1413_v59 = vadd.f32 %v1681_v55, %v1372_v44 }
 0x24b   :  { %v1460_v60 = vmul.f32 1.442695, %v1451_v58  ;;  %v1454_v61 = vadd.f32 %v1703_v57, %v1413_v59 }
 0x24d   :  { %1781 = vpow2.f32 %v1460_v60  ;;  %v1462_v62 = vmul.f32 1.442695, %v1454_v61 }
 0x24f   :  { %1783 = vpow2.f32 %v1462_v62 }
 0x257   :  { %v1782_v1 = vpop.eup %1781 }
 0x258   :  { %v1464_v2 = vsel %vm1459_vm0, %v1782_v1, %v1451_v58 }
 0x259   :  { %v1784_v3 = vpop.eup %1783  ;;  %1466 = vst [vmem:[#allocation10] sm:$0xff] %v1464_v2 }
 0x25a   :  { %v1465_v4 = vsel %vm1459_vm0, %v1784_v3, %v1454_v61 }
 0x25b   :  { %1467 = vst [vmem:[#allocation10 + $0x8] sm:$0xff] %v1465_v4 }
 0x25c   :  { %1472 = vsyncadd [#allocation4], 224  ;;  %s1914_s4 = smov [#allocation10]  }
 0x25d   :  { %s1473_s21 = sshll.u32 %s1914_s4, 4  ;;  %s1474_s21 = int_to_ptr.vmem [resolvable:$true] %s1473_s21 }
 0x25e   :  { %s1873_s22 = scalar_lea.vmem %s1474_s21, 32  ;;  %s1877_s23 = scalar_lea.vmem %s1474_s21, 256 }
 0x25f   :  { %p1874_p4 = scmp.ne.s32.totalorder %s1474_s21, %s1873_s22  ;;  %p1878_p5 = scmp.lt.s32.totalorder %s1474_s21, %s1474_s21 }
 0x260   :  { %p1879_p6 = scmp.lt.s32.totalorder %s1877_s23, %s1873_s22 }
 0x262   :  { %p1880_p7 = por %p1879_p6, %p1878_p5 }
 0x264   :  { %p1881_p8 = pnand %p1880_p7, %p1874_p4 }
 0x266   :  { %1884 = shalt.err (!%p1881_p8)
}
 0x267   :  { %s1885_s26 = scalar_lea.hbm %s2050_s5, 32 }
 0x268   :  { %p1886_p9 = scmp.ne.s32.totalorder %s2050_s5, %s1885_s26  ;;  %p1889_p10 = scmp.lt.u32.totalorder %s1885_s26, %s2050_s5 }
 0x26a   :  { %p1891_p11 = pnand %p1889_p10, %p1886_p9 }
 0x26c   :  { %1894 = shalt.err (!%p1891_p11)
}
 0x26d   :  { %1479 = dma.vmem_to_hbm [thread:$0]  %s1474_s21, 32, %s2050_s5, [#allocation4], %s1905_s29, %s1905_s29, %s1907_s17  }
 0x26e   :  { %1901 = dma.done.wait [#allocation4], 256  }
 0x26f   :  { %1902 = vsyncadd [#allocation4], 4294967040 }
 0x270   :  { %1483 = vsyncpa [#allocation3], 1 }
 0x271   :  { %1484 = vsyncpa [#allocation6], 1 }
 0x272   :  { %1485 = vsyncpa [#allocation9], 1 }
 0x273   :  { %1486 = vsyncpa [#allocation4], 1 }

</bundles_post_ra>
